<compile_context>
chip_gen: v5e
topology: v5e:2x2
jax: 0.10.0
libtpu: 0.0.40
codegen_flags: <defaults>
</compile_context>

<pallas_src>
import jax
import jax.numpy as jnp
from jax.experimental import pallas as pl
from jax.experimental.pallas import tpu as pltpu

_LANE = 128  # TPU vreg lane width


def _linqn1_kernel(x_ref, wt_ref, b_ref, o_ref):
    # x_ref : (B, Cin)          f32
    # wt_ref: (Cin, Cout_pad)   f32  (already transposed + lane-padded)
    # b_ref : (1, Cout_pad)     f32  (lane-padded bias row)
    # o_ref : (B, Cout_pad)     f32  (lane-dense output slab)
    x = x_ref[...]
    wt = wt_ref[...]
    acc = jnp.dot(x, wt, preferred_element_type=jnp.float32)  # MXU, f32 acc
    o_ref[...] = (acc + b_ref[...]).astype(o_ref.dtype)


def linqn1_forward(x: jax.Array, weight: jax.Array, bias: jax.Array) -> jax.Array:
    """x: (B, Cin) f32, weight: (Cout, Cin) f32 (torch layout), bias: (Cout,) f32."""
    B, Cin = x.shape
    Cout, Cin_w = weight.shape
    assert Cin == Cin_w, "in_channels mismatch"
    assert bias.shape == (Cout,), "bias shape mismatch"

    # Pad the output/feature dim up to a full lane width (multiple of 128) so
    # the kernel's stores are unmasked and lane-dense. Done once in XLA,
    # outside the kernel hot path.
    cout_pad = max(_LANE, ((Cout + _LANE - 1) // _LANE) * _LANE)

    # Pre-transpose the weight to (Cin, Cout_pad): no w.T inside the kernel.
    wt = jnp.zeros((Cin, cout_pad), dtype=weight.dtype).at[:, :Cout].set(weight.T)
    b = jnp.zeros((1, cout_pad), dtype=bias.dtype).at[:, :Cout].set(bias[None, :])

    out_pad = pl.pallas_call(
        _linqn1_kernel,
        out_shape=jax.ShapeDtypeStruct((B, cout_pad), x.dtype),
        # Single invocation, full arrays resident in VMEM (tiny problem).
        in_specs=[
            pl.BlockSpec(memory_space=pltpu.MemorySpace.VMEM),
            pl.BlockSpec(memory_space=pltpu.MemorySpace.VMEM),
            pl.BlockSpec(memory_space=pltpu.MemorySpace.VMEM),
        ],
        out_specs=pl.BlockSpec(memory_space=pltpu.MemorySpace.VMEM),
    )(x, wt, b)

    # Strip the lane padding back to the real num_actions width.
    return out_pad[:, :Cout]


if __name__ == "__main__":
    in_channels, num_actions = 4, 2
    batch = 8

    key = jax.random.PRNGKey(0)
    kx, kw, kb = jax.random.split(key, 3)

    x = jax.random.normal(kx, (batch, in_channels), dtype=jnp.float32)

    # Deterministic nn.Linear-style params (uniform in +/- 1/sqrt(fan_in)).
    bound = 1.0 / (in_channels ** 0.5)
    weight = jax.random.uniform(
        kw, (num_actions, in_channels), dtype=jnp.float32, minval=-bound, maxval=bound
    )
    bias = jax.random.uniform(
        kb, (num_actions,), dtype=jnp.float32, minval=-bound, maxval=bound
    )

    out = linqn1_forward(x, weight, bias)
    out = jax.block_until_ready(out)

    # Reference: x @ W.T + b
    ref = x @ weight.T + bias[None, :]
    assert out.shape == (batch, num_actions)
    assert jnp.allclose(out, ref, atol=1e-6), "mismatch vs reference"

    print("KERNEL_OK")
</pallas_src>

<mosaic_0001>
module attributes {stable_mosaic.version = 11 : i64} {
  func.func @_linqn1_kernel(%arg0: memref<8x4xf32, #tpu.memory_space<vmem>>, %arg1: memref<4x128xf32, #tpu.memory_space<vmem>>, %arg2: memref<1x128xf32, #tpu.memory_space<vmem>>, %arg3: memref<8x128xf32, #tpu.memory_space<vmem>>) attributes {dimension_semantics = [], scalar_prefetch = 0 : i64, scratch_operands = 0 : i64, tpu.core_type = #tpu.core_type<tc>} {
    %c0 = arith.constant 0 : index
    %c0_0 = arith.constant 0 : index
    %0 = vector.load %arg0[%c0, %c0_0] : memref<8x4xf32, #tpu.memory_space<vmem>>, vector<8x4xf32>
    %c0_1 = arith.constant 0 : index
    %c0_2 = arith.constant 0 : index
    %1 = vector.load %arg1[%c0_1, %c0_2] : memref<4x128xf32, #tpu.memory_space<vmem>>, vector<4x128xf32>
    %cst = arith.constant dense<0.000000e+00> : vector<8x128xf32>
    %2 = tpu.matmul %0, %1, %cst {dimension_numbers = #tpu.dot_dimension_numbers<[1], [0], [0], [1], [0, 0, 1, 1], [], []>} : vector<8x4xf32>, vector<4x128xf32>, vector<8x128xf32> -> vector<8x128xf32>
    %c0_3 = arith.constant 0 : index
    %c0_4 = arith.constant 0 : index
    %3 = vector.load %arg2[%c0_3, %c0_4] : memref<1x128xf32, #tpu.memory_space<vmem>>, vector<1x128xf32>
    %4 = vector.broadcast %3 : vector<1x128xf32> to vector<8x128xf32>
    %5 = arith.addf %2, %4 : vector<8x128xf32>
    %c0_5 = arith.constant 0 : index
    %c0_6 = arith.constant 0 : index
    %6 = vector.load %arg3[%c0_5, %c0_6] : memref<8x128xf32, #tpu.memory_space<vmem>>, vector<8x128xf32>
    tpu.vector_store %arg3[%c0_5, %c0_6], %5 {strides = array<i32>} : memref<8x128xf32, #tpu.memory_space<vmem>>, vector<8x128xf32>,
    return
  }
}

</mosaic_0001>

<bundles_post_ra>
// kernel: tpu_custom_call.1
= control target key start
LH: loop header
LB: loop body
LE: loop exit
PB: predicated region body
PF: predicated region fallthrough
CT: control target
= control target key end

     0   :  { %vm25_vm0 = vcmask 1043456   ;;  %vm21_vm1 = vcmask 31744   ;;  %s129_s0 = inlined_call_operand.vmem [shape: f32[8,4], index: 0, kind: input, shape index: {}]   ;;  %s130_s1 = inlined_call_operand.vmem [shape: f32[4,128], index: 1, kind: input, shape index: {}]   ;;  %s131_s2 = inlined_call_operand.vmem [shape: f32[1,128], index: 2, kind: input, shape index: {}]   ;;  %s132_s3 = inlined_call_operand.hbm [shape: f32[8,128], index: 3, kind: output, shape index: {}]  }
   0x1   :  { %v16_v0 = vld [vmem:[%s130_s1] sm:$0xf] }
   0x2   :  { %v15_v1 = vld [vmem:[%s129_s0] sm:$0xff]  ;;  %66 = vmatpush.msk.msra.mxu0 %vm25_vm0, %v16_v0 }
   0x3   :  { %8 = vsyncpa [#allocation3], 0  ;;  %67 = vmatmul.msk.f32.vlgmr.msra.gmra.mxu0 %vm21_vm1, %v15_v1  ;;  %v69_v2 = vld [vmem:[%s131_s2] ss:$0 sm:$0xff]  ;;  %s96_s18 = smov [#allocation2]   ;;  %s57_s22 = sshll.u32 %s132_s3, 4  ;;  %s58_s22 = int_to_ptr.hbm [resolvable:$true] %s57_s22 }
   0x4   :  { %s55_s19 = sshll.u32 %s96_s18, 4  ;;  %s56_s19 = int_to_ptr.vmem [resolvable:$true] %s55_s19 }
  0x80   :  { %v46_v3 = vpop.f32.mrf.mxu0 }
  0x81   :  { %v47_v4 = vadd.f32 %v69_v2, %v46_v3 }
  0x83   :  { %49 = vst [vmem:[#allocation2] sm:$0xff] %v47_v4 }
  0x84   :  { %60 = dma.vmem_to_hbm [thread:$0]  %s56_s19, 128, %s58_s22, [#allocation3]  }
  0x85   :  { %94 = dma.done.wait [#allocation3], 128  }
  0x86   :  { %95 = vsyncadd [#allocation3], 4294967168 }
  0x87   :  { %65 = vsyncpa [#allocation3], 1 }

</bundles_post_ra>
